<compile_context>
chip_gen: v6e
topology: v6e:2x2x1
jax: 0.10.0
libtpu: 0.0.40
codegen_flags: <defaults>
</compile_context>

<pallas_src>
import jax
import jax.numpy as jnp
from jax.experimental import pallas as pl
from jax.experimental.pallas import tpu as pltpu


_LANE = 128      # last-dim vreg tiling (lanes)
_SUBLANE = 8     # second-to-last dim vreg tiling (sublanes)
_F32 = 4         # bytes


def _round_up(x, m):
    return (x + m - 1) // m * m


def _cdiv(a, b):
    return (a + b - 1) // b


def _tpu_vmem_info():
    """(budget_bytes, physical_bytes) for kernel buffers, generation-aware.

    Falls back to the most conservative modern part (v7x: 64 MiB physical per
    TensorCore) if the hardware query is unavailable.
    """
    phys = 64 * 1024 * 1024
    try:
        info = pltpu.get_tpu_info()
        for name in ("vmem_capacity_bytes", "vmem_bytes", "vmem_size_bytes"):
            v = getattr(info, name, None)
            if v:
                phys = int(v)
                break
    except Exception:
        pass
    # Use < half of physical VMEM for our own buffers; leave headroom for
    # Mosaic internal scratch, semaphores, and the double-buffering slack.
    budget = max(8 * 1024 * 1024, int(phys * 0.45))
    return budget, phys


# --------------------------------------------------------------------------
# Kernels
# --------------------------------------------------------------------------

def _sigmoid_exact(z):
    # sigmoid(z) == 0.5 * (tanh(z/2) + 1): a single EUP push, exact numerics.
    return 0.5 * (jnp.tanh(0.5 * z) + 1.0)


def _perceptron_kernel_fused(x_ref, w_ref, b_ref, o_ref):
    """o = sigmoid(x @ Wt + b), whole reduction dim resident in VMEM.

    x_ref: (TB, K)        activation tile
    w_ref: (K, N_pad)     pre-transposed weight (resident across the grid)
    b_ref: (1, N_pad)     bias (zero-padded)
    o_ref: (TB, N_pad)    lane-dense output tile
    """
    z = jnp.dot(x_ref[...], w_ref[...], preferred_element_type=jnp.float32)
    z = z + b_ref[...]
    o_ref[...] = _sigmoid_exact(z).astype(o_ref.dtype)


def _perceptron_kernel_ktiled(x_ref, w_ref, b_ref, o_ref, acc_ref):
    """K-tiled variant for layers whose resident weight exceeds the VMEM budget.

    Grid = (batch_tiles, k_tiles); acc_ref is an f32 VMEM accumulator.
    """
    k = pl.program_id(1)

    @pl.when(k == 0)
    def _():
        acc_ref[...] = jnp.zeros_like(acc_ref)

    acc_ref[...] += jnp.dot(x_ref[...], w_ref[...],
                            preferred_element_type=jnp.float32)

    @pl.when(k == pl.num_programs(1) - 1)
    def _():
        z = acc_ref[...] + b_ref[...]
        o_ref[...] = _sigmoid_exact(z).astype(o_ref.dtype)


# --------------------------------------------------------------------------
# Parameter preparation (one-time, outside the forward path)
# --------------------------------------------------------------------------

def prepare_params(weight, bias, *, w_budget_bytes):
    """One-time packing of nn.Linear params for the kernel.

    weight: (n_out, n_inp) f32 (PyTorch nn.Linear layout); bias: (n_out,) f32.
    Returns (w_t, b2d, n_out, n_inp, tk) where
      w_t : (K_pad, n_out_pad) = zero-padded weight.T  (MXU-native RHS layout)
      b2d : (1, n_out_pad)      = zero-padded bias
      tk  : reduction-dim tile (== n_inp when the whole weight fits VMEM).
    """
    n_out, n_inp = weight.shape
    n_out_pad = _round_up(n_out, _LANE)

    # Does the (double-buffered) resident weight fit the per-operand budget?
    if 2 * n_inp * n_out_pad * _F32 <= w_budget_bytes:
        tk = n_inp
        k_pad = n_inp
    else:
        # K-tiling fallback: tile the reduction dim in multiples of 128 lanes.
        # (Extremely wide layers would additionally need N-tiling of the
        #  output; not required for typical perceptron layer sizes.)
        tk = max(_LANE, (w_budget_bytes // (2 * n_out_pad * _F32)) // _LANE * _LANE)
        k_pad = _round_up(n_inp, tk)

    w_t = jnp.zeros((k_pad, n_out_pad), weight.dtype).at[:n_inp, :n_out].set(weight.T)
    b2d = jnp.zeros((1, n_out_pad), bias.dtype).at[0, :n_out].set(bias)
    return w_t, b2d, n_out, n_inp, tk


# --------------------------------------------------------------------------
# Forward
# --------------------------------------------------------------------------

def _pick_batch_tile(batch, k_block, n_out_pad, fixed_bytes, budget_bytes, cap):
    """Largest batch tile (multiple of 8, <= cap) whose working set fits the
    budget.  x/out tiles are double-buffered; the accumulator is charged once
    (only present on the K-tiled path, but counted conservatively)."""
    tb = min(cap, _round_up(batch, _SUBLANE))

    def var_bytes(t):
        return (2 * t * k_block + 2 * t * n_out_pad + t * n_out_pad) * _F32

    while tb > _SUBLANE and fixed_bytes + var_bytes(tb) > budget_bytes:
        tb = max(_SUBLANE, _round_up(tb // 2, _SUBLANE))
    return tb


def perceptron_forward(x, w_t, b2d, n_out, n_inp, tk):
    """x: (B, n_inp) f32; (w_t, b2d, n_out, n_inp, tk) from prepare_params.
    Returns sigmoid(x @ W.T + b), shape (B, n_out)."""
    B = x.shape[0]
    k_pad, n_out_pad = w_t.shape
    k_tiles = k_pad // tk

    budget, phys = _tpu_vmem_info()

    if k_pad != n_inp:
        # Huge-layer fallback only: pad the activation feature dim so the
        # zero rows of the padded weight multiply zeros, never edge garbage.
        x = jnp.zeros((B, k_pad), x.dtype).at[:, :n_inp].set(x)

    # Resident-per-step fixed footprint: weight tile + bias, double-buffered
    # (Pallas allocates 2 buffers per BlockSpec by default even for blocks
    #  whose index_map is constant, so 2x is the accurate charge here).
    fixed_bytes = (2 * tk * n_out_pad + 2 * n_out_pad) * _F32

    # 128-MiB-VMEM parts (v5e/v6e) can afford bigger batch tiles than v7x.
    tb_cap = 1024 if phys >= 128 * 1024 * 1024 else 512
    TB = _pick_batch_tile(B, tk, n_out_pad, fixed_bytes, budget, tb_cap)

    # Guarantee >= 2 batch grid steps when the batch allows it, so the
    # "parallel" axis can actually be split across v7x's two TensorCores.
    nb = _cdiv(B, TB)
    if nb < 2 and TB > _SUBLANE:
        TB = min(TB, max(_SUBLANE, _round_up(_cdiv(B, 2), _SUBLANE)))
        nb = _cdiv(B, TB)

    footprint = fixed_bytes + (2 * TB * tk + 2 * TB * n_out_pad + TB * n_out_pad) * _F32
    vmem_limit = int(min(phys * 9 // 10,
                         max(32 * 1024 * 1024, footprint + 8 * 1024 * 1024)))

    cost = pl.CostEstimate(
        flops=int(2 * B * k_pad * n_out_pad),
        transcendentals=int(B * n_out_pad),
        bytes_accessed=int((B * k_pad + k_pad * n_out_pad + n_out_pad
                            + B * n_out_pad) * _F32),
    )

    if k_tiles == 1:
        grid_spec = pltpu.PrefetchScalarGridSpec(
            num_scalar_prefetch=0,
            grid=(nb,),
            in_specs=[
                pl.BlockSpec((TB, k_pad), lambda i: (i, 0)),          # batch-tiled x
                pl.BlockSpec((k_pad, n_out_pad), lambda i: (0, 0)),   # resident W^T
                pl.BlockSpec((1, n_out_pad), lambda i: (0, 0)),       # resident bias
            ],
            out_specs=pl.BlockSpec((TB, n_out_pad), lambda i: (i, 0)),
        )
        kernel = _perceptron_kernel_fused
        dims = ("parallel",)
    else:
        grid_spec = pltpu.PrefetchScalarGridSpec(
            num_scalar_prefetch=0,
            grid=(nb, k_tiles),
            in_specs=[
                pl.BlockSpec((TB, tk), lambda i, k: (i, k)),
                pl.BlockSpec((tk, n_out_pad), lambda i, k: (k, 0)),
                pl.BlockSpec((1, n_out_pad), lambda i, k: (0, 0)),
            ],
            out_specs=pl.BlockSpec((TB, n_out_pad), lambda i, k: (i, 0)),
            scratch_shapes=[pltpu.VMEM((TB, n_out_pad), jnp.float32)],
        )
        kernel = _perceptron_kernel_ktiled
        dims = ("parallel", "arbitrary")

    out = pl.pallas_call(
        kernel,
        out_shape=jax.ShapeDtypeStruct((B, n_out_pad), x.dtype),
        grid_spec=grid_spec,
        compiler_params=pltpu.CompilerParams(
            dimension_semantics=dims,
            vmem_limit_bytes=vmem_limit,
        ),
        cost_estimate=cost,
    )(x, w_t, b2d)

    # Drop padded out-features (they hold sigmoid(0) = 0.5).
    return out[:, :n_out]


if __name__ == "__main__":
    # Small shapes consistent with the module: Net(n_inp=32, n_out=16), batch=8.
    batch, n_inp, n_out = 8, 32, 16

    key = jax.random.PRNGKey(0)
    kx, kw, kb = jax.random.split(key, 3)

    x = jax.random.normal(kx, (batch, n_inp), dtype=jnp.float32)
    # Deterministic init mimicking nn.Linear's uniform(-1/sqrt(n_inp), 1/sqrt(n_inp)).
    bound = 1.0 / jnp.sqrt(jnp.float32(n_inp))
    weight = jax.random.uniform(kw, (n_out, n_inp), dtype=jnp.float32,
                                minval=-bound, maxval=bound)
    bias = jax.random.uniform(kb, (n_out,), dtype=jnp.float32,
                              minval=-bound, maxval=bound)

    # One-time parameter packing (transpose + lane-dense padding), off the
    # per-call forward path.
    budget, _ = _tpu_vmem_info()
    params = prepare_params(weight, bias, w_budget_bytes=budget // 2)

    y = perceptron_forward(x, *params)
    y = jax.block_until_ready(y)

    # Reference check in plain JAX (same math as torch.sigmoid(fc1(x))).
    y_ref = jax.nn.sigmoid(x @ weight.T + bias)
    assert y.shape == (batch, n_out)
    assert jnp.allclose(y, y_ref, atol=1e-5, rtol=1e-5), \
        float(jnp.max(jnp.abs(y - y_ref)))

    print("KERNEL_OK")
</pallas_src>

<mosaic_0001>
module attributes {stable_mosaic.version = 11 : i64} {
  func.func @_perceptron_kernel_fused(%arg0: i32, %arg1: memref<8x32xf32, #tpu.memory_space<vmem>>, %arg2: memref<32x128xf32, #tpu.memory_space<vmem>>, %arg3: memref<1x128xf32, #tpu.memory_space<vmem>>, %arg4: memref<8x128xf32, #tpu.memory_space<vmem>>) attributes {dimension_semantics = [#tpu.dimension_semantics<parallel>], iteration_bounds = array<i64: 1>, scalar_prefetch = 0 : i64, scratch_operands = 0 : i64, tpu.core_type = #tpu.core_type<tc>, window_params = [{transform_indices = @transform_0, window_bounds = array<i64: 8, 32>}, {pipeline_mode = #tpu.pipeline_mode<synchronous>, transform_indices = @transform_1, window_bounds = array<i64: 32, 128>}, {pipeline_mode = #tpu.pipeline_mode<synchronous>, transform_indices = @transform_2, window_bounds = array<i64: 1, 128>}, {transform_indices = @transform_3, window_bounds = array<i64: 8, 128>}]} {
    %c0 = arith.constant 0 : index
    %c0_0 = arith.constant 0 : index
    %0 = vector.load %arg1[%c0, %c0_0] : memref<8x32xf32, #tpu.memory_space<vmem>>, vector<8x32xf32>
    %c0_1 = arith.constant 0 : index
    %c0_2 = arith.constant 0 : index
    %1 = vector.load %arg2[%c0_1, %c0_2] : memref<32x128xf32, #tpu.memory_space<vmem>>, vector<32x128xf32>
    %cst = arith.constant dense<0.000000e+00> : vector<8x128xf32>
    %2 = tpu.matmul %0, %1, %cst {dimension_numbers = #tpu.dot_dimension_numbers<[1], [0], [0], [1], [0, 0, 1, 1], [], []>} : vector<8x32xf32>, vector<32x128xf32>, vector<8x128xf32> -> vector<8x128xf32>
    %c0_3 = arith.constant 0 : index
    %c0_4 = arith.constant 0 : index
    %3 = vector.load %arg3[%c0_3, %c0_4] : memref<1x128xf32, #tpu.memory_space<vmem>>, vector<1x128xf32>
    %4 = vector.broadcast %3 : vector<1x128xf32> to vector<8x128xf32>
    %5 = arith.addf %2, %4 : vector<8x128xf32>
    %cst_5 = arith.constant 5.000000e-01 : f32
    %6 = vector.broadcast %cst_5 : f32 to vector<8x128xf32>
    %7 = arith.mulf %6, %5 : vector<8x128xf32>
    %8 = math.tanh %7 : vector<8x128xf32>
    %cst_6 = arith.constant 1.000000e+00 : f32
    %9 = vector.broadcast %cst_6 : f32 to vector<8x128xf32>
    %10 = arith.addf %8, %9 : vector<8x128xf32>
    %cst_7 = arith.constant 5.000000e-01 : f32
    %11 = vector.broadcast %cst_7 : f32 to vector<8x128xf32>
    %12 = arith.mulf %11, %10 : vector<8x128xf32>
    %c0_8 = arith.constant 0 : index
    %c0_9 = arith.constant 0 : index
    %13 = vector.load %arg4[%c0_8, %c0_9] : memref<8x128xf32, #tpu.memory_space<vmem>>, vector<8x128xf32>
    tpu.vector_store %arg4[%c0_8, %c0_9], %12 {strides = array<i32>} : memref<8x128xf32, #tpu.memory_space<vmem>>, vector<8x128xf32>,
    return
  }
  func.func @transform_0(%arg0: i32) -> (i32, i32) {
    %c0_i32 = arith.constant 0 : i32
    %c0_i32_0 = arith.constant 0 : i32
    return %arg0, %c0_i32 : i32, i32
  }
  func.func @transform_1(%arg0: i32) -> (i32, i32) {
    %c0_i32 = arith.constant 0 : i32
    %c0_i32_0 = arith.constant 0 : i32
    %c0_i32_1 = arith.constant 0 : i32
    return %c0_i32, %c0_i32_0 : i32, i32
  }
  func.func @transform_2(%arg0: i32) -> (i32, i32) {
    %c0_i32 = arith.constant 0 : i32
    %c0_i32_0 = arith.constant 0 : i32
    %c0_i32_1 = arith.constant 0 : i32
    return %c0_i32, %c0_i32_0 : i32, i32
  }
  func.func @transform_3(%arg0: i32) -> (i32, i32) {
    %c0_i32 = arith.constant 0 : i32
    %c0_i32_0 = arith.constant 0 : i32
    return %arg0, %c0_i32 : i32, i32
  }
}

</mosaic_0001>

<bundles_post_ra>
// kernel: tpu_custom_call.1
= control target key start
LH: loop header
LB: loop body
LE: loop exit
PB: predicated region body
PF: predicated region fallthrough
CT: control target
= control target key end

     0   :  { %8 = vsyncpa [#allocation3], 0  ;;  %s280_s0 = inlined_call_operand.hbm [shape: f32[8,32], index: 0, kind: input, shape index: {}]   ;;  %s281_s1 = inlined_call_operand.hbm [shape: f32[32,128], index: 1, kind: input, shape index: {}]   ;;  %s282_s2 = inlined_call_operand.vmem [shape: f32[1,128], index: 2, kind: input, shape index: {}]   ;;  %s283_s3 = inlined_call_operand.hbm [shape: f32[8,128], index: 3, kind: output, shape index: {}]  }
   0x1   :  { %9 = vsyncpa [#allocation6], 0 }
   0x2   :  { %10 = vsyncpa [#allocation4], 0  ;;  %s241_s12 = smov [#allocation2]   ;;  %s242_s14 = smov [#allocation5]  }
   0x3   :  { %s17_s13 = sshll.u32 %s241_s12, 4  ;;  %s26_s15 = sshll.u32 %s242_s14, 4  ;;  %s18_s13 = int_to_ptr.vmem [resolvable:$true] %s17_s13  ;;  %s27_s15 = int_to_ptr.vmem [resolvable:$true] %s26_s15 }
   0x4   :  { %s183_s16 = scalar_lea.vmem %s18_s13, 128  ;;  %p188_p1 = scmp.lt.s32.totalorder %s18_s13, %s18_s13 }
   0x5   :  { %p184_p0 = scmp.ne.s32.totalorder %s18_s13, %s183_s16  ;;  %p189_p2 = scmp.lt.s32.totalorder %s183_s16, %s183_s16 }
   0x7   :  { %p190_p3 = por %p189_p2, %p188_p1 }
   0x9   :  { %p191_p4 = pnand %p190_p3, %p184_p0 }
   0xb   :  { %194 = shalt.err (!%p191_p4)
}
   0xc   :  { %20 = dma.hbm_to_vmem [thread:$0]  %s280_s0, 128, %s18_s13, [#allocation3]  }
   0xd   :  { %s203_s19 = scalar_lea.vmem %s27_s15, 512  ;;  %p208_p6 = scmp.lt.s32.totalorder %s27_s15, %s27_s15 }
   0xe   :  { %p204_p5 = scmp.ne.s32.totalorder %s27_s15, %s203_s19  ;;  %p209_p7 = scmp.lt.s32.totalorder %s203_s19, %s203_s19 }
  0x10   :  { %p210_p8 = por %p209_p7, %p208_p6 }
  0x12   :  { %p211_p9 = pnand %p210_p8, %p204_p5 }
  0x14   :  { %214 = shalt.err (!%p211_p9)
}
  0x15   :  { %s243_s20 = smov 128   ;;  %s244_s21 = smov 8  }
  0x16   :  { %32 = dma.hbm_to_vmem [thread:$0]  %s281_s1, 512, %s27_s15, [#allocation6], %s243_s20, %s243_s20, %s244_s21  }
  0x17   :  { %235 = dma.done.wait [#allocation3], 128  }
  0x18   :  { %236 = vsyncadd [#allocation3], 4294967168 }
  0x19   :  { %237 = dma.done.wait [#allocation6], 512  }
  0x1a   :  { %238 = vsyncadd [#allocation6], 4294966784  ;;  %v245_v0 = vmov 0.0   ;;  %vm246_vm0 = vmmov 0   ;;  %v45_v1 = vld [vmem:[#allocation5 + $0x18] sm:$0xff]  ;;  %v44_v2 = vld [vmem:[#allocation5 + $0x10] sm:$0xff] }
  0x1b   :  { %155 = vmatprep.subr.mxu0 %v245_v0  ;;  %163 = vmatprep.mubr.msk.f32.mxu0 %vm246_vm0, %v245_v0  ;;  %v43_v3 = vld [vmem:[#allocation5 + $0x8] sm:$0xff]  ;;  %v42_v4 = vld [vmem:[#allocation5] sm:$0xff]  ;;  %v41_v5 = vld [vmem:[#allocation2] sm:$0xff]  ;;  %vm53_vm1 = vcmask 261120   ;;  %s247_s24 = smov [#allocation7]  }
  0x1c   :  { %156 = vmatpush3.msra.mxu0 %v45_v1  ;;  %v148_v6 = vld [vmem:[%s282_s2] ss:$0 sm:$0xff]  ;;  %s138_s25 = sshll.u32 %s247_s24, 4  ;;  %s139_s25 = int_to_ptr.vmem [resolvable:$true] %s138_s25 }
  0x1d   :  { %157 = vmatprep.subr.mxu0 %v245_v0  ;;  %s215_s26 = scalar_lea.vmem %s139_s25, 128  ;;  %p220_p11 = scmp.lt.s32.totalorder %s139_s25, %s139_s25 }
  0x1e   :  { %158 = vmatpush3.msra.mxu0 %v44_v2  ;;  %p216_p10 = scmp.ne.s32.totalorder %s139_s25, %s215_s26  ;;  %p221_p12 = scmp.lt.s32.totalorder %s215_s26, %s215_s26 }
  0x1f   :  { %159 = vmatprep.subr.mxu0 %v245_v0 }
  0x20   :  { %160 = vmatpush3.msra.mxu0 %v43_v3  ;;  %p222_p13 = por %p221_p12, %p220_p11 }
  0x21   :  { %161 = vmatprep.subr.mxu0 %v245_v0 }
  0x22   :  { %162 = vmatpush3.msra.mxu0 %v42_v4  ;;  %p223_p0 = pnand %p222_p13, %p216_p10 }
  0x23   :  { %164 = vmatmul.mubr.msk.f32.vlgmr.msra.gmra.mxu0 %vm53_vm1, %v41_v5 }
  0xe3   :  { %v123_v7 = vpop.f32.mrf.mxu0 }
  0xe4   :  { %v124_v8 = vadd.f32 %v148_v6, %v123_v7 }
  0xe5   :  { %v165_v9 = vpop.f32.mrf.mxu0 }
  0xe6   :  { %v127_v10 = vmul.f32 0.5, %v124_v8 }
  0xe8   :  { %173 = vtanh.f32 %v127_v10 }
  0xf5   :  { %v174_v11 = vpop.eup %173 }
  0xf6   :  { %v129_v12 = vadd.f32 1.0, %v174_v11 }
  0xf8   :  { %v130_v13 = vmul.f32 0.5, %v129_v12 }
  0xfa   :  { %131 = vst [vmem:[#allocation7] sm:$0xff] %v130_v13 }
  0xfb   :  { %226 = shalt.err (!%p223_p0)
}
  0xfc   :  { %141 = dma.vmem_to_hbm [thread:$0]  %s139_s25, 128, %s283_s3, [#allocation4]  }
  0xfd   :  { %239 = dma.done.wait [#allocation4], 128  }
  0xfe   :  { %240 = vsyncadd [#allocation4], 4294967168 }
  0xff   :  { %145 = vsyncpa [#allocation3], 1 }
 0x100   :  { %146 = vsyncpa [#allocation6], 1 }
 0x101   :  { %147 = vsyncpa [#allocation4], 1 }

</bundles_post_ra>
